<compile_context>
chip_gen: v7x
topology: tpu7x:2x2x1
jax: 0.10.0
libtpu: 0.0.40
codegen_flags: <defaults>
</compile_context>

<pallas_src>
import jax
import jax.numpy as jnp
import numpy as np
from jax.experimental import pallas as pl
from jax.experimental.pallas import tpu as pltpu

# ---------------- problem sizes (small, consistent with the module) ----------
B = 2     # batch
L = 3     # number of wav2vec hidden-state layers being summed
T = 16    # time frames
E = 32    # wav2vec hidden_size (embedding_dim)
H = 32    # hparams['emotion_embedding_dim']
K = 5     # conv kernel size, padding = 2
PAD = 2


def emo_hidden_kernel(hid_ref, w1_ref, b1_ref, w2_ref, b2_ref, out_ref):
    # hid_ref : (L, B, T, E)  -- all wav2vec hidden states, all batch elements
    # w1_ref  : (K*E, H), b1_ref: (1, H)    (tap-major im2col weight layout)
    # w2_ref  : (K*H, H), b2_ref: (1, H)
    # out_ref : (B, H)
    n_layers, batch, t_len, e_dim = hid_ref.shape
    h_dim = out_ref.shape[-1]
    k_taps = w1_ref.shape[0] // e_dim          # == K (static)
    pad = (k_taps - 1) // 2                    # == PAD (static)

    # --- sum over wav2vec layers (== `sum(hidden_all)`), pure VPU adds -------
    emb = jnp.sum(hid_ref[...], axis=0)                      # (B, T, E) f32

    def conv_relu(x, w_flat, b, cin):
        # x: (B, T, cin) -> relu(Conv1d(k=K, pad=PAD)) as one im2col matmul.
        zpad = jnp.zeros((batch, pad, cin), jnp.float32)
        xp = jnp.concatenate([zpad, x, zpad], axis=1)         # (B, T+2*pad, cin)
        # im2col: col[b, t, k*cin + c] = xp[b, t + k, c]  (static shifted slices)
        col = jnp.concatenate(
            [xp[:, k:k + t_len, :] for k in range(k_taps)], axis=-1)
        col = col.reshape(batch * t_len, k_taps * cin)        # (B*T, K*cin)
        y = jnp.dot(col, w_flat,
                    preferred_element_type=jnp.float32) + b   # (B*T, H)
        return jnp.maximum(y, 0.0)                            # ReLU (VPU)

    h1 = conv_relu(emb, w1_ref[...], b1_ref[...], e_dim)       # (B*T, H)
    h2 = conv_relu(h1.reshape(batch, t_len, h_dim),
                   w2_ref[...], b2_ref[...], h_dim)            # (B*T, H)

    # --- mean over time -> emo_hidden, written once as a single (B, H) block
    out_ref[...] = jnp.mean(
        h2.reshape(batch, t_len, h_dim), axis=1).astype(out_ref.dtype)


def pitch_model_emo_hidden(hidden_states, w1, b1, w2, b2):
    """hidden_states: (L, B, T, E) float32.  Returns emo_hidden: (B, H)."""
    n_layers, batch, t_len, e_dim = hidden_states.shape
    k_taps, _, h_dim = w1.shape

    # Flatten conv weights tap-major for the im2col matmul:
    #   w[k, c, h] -> w_flat[k*Cin + c, h]
    w1_2d = w1.reshape(k_taps * e_dim, h_dim)
    w2_2d = w2.reshape(k_taps * h_dim, h_dim)
    b1_2d = b1.reshape(1, h_dim)
    b2_2d = b2.reshape(1, h_dim)

    out = pl.pallas_call(
        emo_hidden_kernel,
        out_shape=jax.ShapeDtypeStruct((batch, h_dim), jnp.float32),
        in_specs=[pl.BlockSpec(memory_space=pltpu.MemorySpace.VMEM)] * 5,
        out_specs=pl.BlockSpec(memory_space=pltpu.MemorySpace.VMEM),
    )(hidden_states, w1_2d, b1_2d, w2_2d, b2_2d)
    return out


# ---------------- pure-JAX reference (same math, no Pallas) ------------------
def reference_emo_hidden(hidden_states, w1, b1, w2, b2):
    emb = jnp.sum(hidden_states, axis=0)                      # (B, T, E)

    def conv_nlc(x, w, b):
        _, t, _ = x.shape
        xp = jnp.pad(x, ((0, 0), (PAD, PAD), (0, 0)))
        y = b[None, None, :]
        for k in range(K):
            y = y + jnp.einsum('btc,cd->btd', xp[:, k:k + t, :], w[k])
        return y

    h1 = jnp.maximum(conv_nlc(emb, w1, b1), 0.0)
    h2 = jnp.maximum(conv_nlc(h1, w2, b2), 0.0)
    return jnp.mean(h2, axis=1)                               # (B, H)


if __name__ == "__main__":
    key = jax.random.PRNGKey(0)
    k_hid, k_w1, k_b1, k_w2, k_b2 = jax.random.split(key, 5)

    # synthetic summand of wav2vec hidden states: (L, B, T, E)
    hidden_states = jax.random.normal(k_hid, (L, B, T, E), dtype=jnp.float32)

    # Conv1d weights stored tap-major as (K, Cin, Cout); PyTorch default-style
    # uniform init with bound 1/sqrt(Cin * K).
    bound1 = 1.0 / np.sqrt(E * K)
    bound2 = 1.0 / np.sqrt(H * K)
    w1 = jax.random.uniform(k_w1, (K, E, H), jnp.float32, -bound1, bound1)
    b1 = jax.random.uniform(k_b1, (H,),      jnp.float32, -bound1, bound1)
    w2 = jax.random.uniform(k_w2, (K, H, H), jnp.float32, -bound2, bound2)
    b2 = jax.random.uniform(k_b2, (H,),      jnp.float32, -bound2, bound2)

    emo_hidden = pitch_model_emo_hidden(hidden_states, w1, b1, w2, b2)
    jax.block_until_ready(emo_hidden)

    ref = reference_emo_hidden(hidden_states, w1, b1, w2, b2)
    np.testing.assert_allclose(np.asarray(emo_hidden), np.asarray(ref),
                               rtol=1e-5, atol=1e-5)
    print("KERNEL_OK")
</pallas_src>

<mosaic_0001>
module attributes {stable_mosaic.version = 11 : i64} {
  func.func @emo_hidden_kernel(%arg0: memref<3x2x16x32xf32, #tpu.memory_space<vmem>>, %arg1: memref<160x32xf32, #tpu.memory_space<vmem>>, %arg2: memref<1x32xf32, #tpu.memory_space<vmem>>, %arg3: memref<160x32xf32, #tpu.memory_space<vmem>>, %arg4: memref<1x32xf32, #tpu.memory_space<vmem>>, %arg5: memref<2x32xf32, #tpu.memory_space<vmem>>) attributes {dimension_semantics = [], scalar_prefetch = 0 : i64, scratch_operands = 0 : i64, tpu.core_type = #tpu.core_type<tc>} {
    %c0 = arith.constant 0 : index
    %c0_0 = arith.constant 0 : index
    %c0_1 = arith.constant 0 : index
    %c0_2 = arith.constant 0 : index
    %0 = vector.load %arg0[%c0, %c0_0, %c0_1, %c0_2] : memref<3x2x16x32xf32, #tpu.memory_space<vmem>>, vector<3x2x16x32xf32>
    %cst = arith.constant dense<0.000000e+00> : vector<2x16x32xf32>
    %1 = vector.multi_reduction <add>, %0, %cst [0] : vector<3x2x16x32xf32> to vector<2x16x32xf32>
    %c0_3 = arith.constant 0 : index
    %c0_4 = arith.constant 0 : index
    %2 = vector.load %arg1[%c0_3, %c0_4] : memref<160x32xf32, #tpu.memory_space<vmem>>, vector<160x32xf32>
    %c0_5 = arith.constant 0 : index
    %c0_6 = arith.constant 0 : index
    %3 = vector.load %arg2[%c0_5, %c0_6] : memref<1x32xf32, #tpu.memory_space<vmem>>, vector<1x32xf32>
    %cst_7 = arith.constant 0.000000e+00 : f32
    %4 = vector.broadcast %cst_7 : f32 to vector<2x2x32xf32>
    %5 = tpu.concatenate %4, %1, %4 in 1 : vector<2x2x32xf32>, vector<2x16x32xf32>, vector<2x2x32xf32> -> vector<2x20x32xf32>
    %6 = vector.extract_strided_slice %5 {offsets = [0, 0, 0], sizes = [2, 16, 32], strides = [1, 1, 1]} : vector<2x20x32xf32> to vector<2x16x32xf32>
    %7 = vector.extract_strided_slice %5 {offsets = [0, 1, 0], sizes = [2, 16, 32], strides = [1, 1, 1]} : vector<2x20x32xf32> to vector<2x16x32xf32>
    %8 = vector.extract_strided_slice %5 {offsets = [0, 2, 0], sizes = [2, 16, 32], strides = [1, 1, 1]} : vector<2x20x32xf32> to vector<2x16x32xf32>
    %9 = vector.extract_strided_slice %5 {offsets = [0, 3, 0], sizes = [2, 16, 32], strides = [1, 1, 1]} : vector<2x20x32xf32> to vector<2x16x32xf32>
    %10 = vector.extract_strided_slice %5 {offsets = [0, 4, 0], sizes = [2, 16, 32], strides = [1, 1, 1]} : vector<2x20x32xf32> to vector<2x16x32xf32>
    %11 = tpu.concatenate %6, %7, %8, %9, %10 in 2 : vector<2x16x32xf32>, vector<2x16x32xf32>, vector<2x16x32xf32>, vector<2x16x32xf32>, vector<2x16x32xf32> -> vector<2x16x160xf32>
    %12 = vector.shape_cast %11 : vector<2x16x160xf32> to vector<32x160xf32>
    %cst_8 = arith.constant dense<0.000000e+00> : vector<32x32xf32>
    %13 = tpu.matmul %12, %2, %cst_8 {dimension_numbers = #tpu.dot_dimension_numbers<[1], [0], [0], [1], [0, 0, 1, 1], [], []>} : vector<32x160xf32>, vector<160x32xf32>, vector<32x32xf32> -> vector<32x32xf32>
    %14 = vector.broadcast %3 : vector<1x32xf32> to vector<32x32xf32>
    %15 = arith.addf %13, %14 : vector<32x32xf32>
    %cst_9 = arith.constant 0.000000e+00 : f32
    %16 = vector.broadcast %cst_9 : f32 to vector<32x32xf32>
    %17 = arith.maximumf %15, %16 : vector<32x32xf32>
    %18 = vector.shape_cast %17 : vector<32x32xf32> to vector<2x16x32xf32>
    %c0_10 = arith.constant 0 : index
    %c0_11 = arith.constant 0 : index
    %19 = vector.load %arg3[%c0_10, %c0_11] : memref<160x32xf32, #tpu.memory_space<vmem>>, vector<160x32xf32>
    %c0_12 = arith.constant 0 : index
    %c0_13 = arith.constant 0 : index
    %20 = vector.load %arg4[%c0_12, %c0_13] : memref<1x32xf32, #tpu.memory_space<vmem>>, vector<1x32xf32>
    %cst_14 = arith.constant 0.000000e+00 : f32
    %21 = vector.broadcast %cst_14 : f32 to vector<2x2x32xf32>
    %22 = tpu.concatenate %21, %18, %21 in 1 : vector<2x2x32xf32>, vector<2x16x32xf32>, vector<2x2x32xf32> -> vector<2x20x32xf32>
    %23 = vector.extract_strided_slice %22 {offsets = [0, 0, 0], sizes = [2, 16, 32], strides = [1, 1, 1]} : vector<2x20x32xf32> to vector<2x16x32xf32>
    %24 = vector.extract_strided_slice %22 {offsets = [0, 1, 0], sizes = [2, 16, 32], strides = [1, 1, 1]} : vector<2x20x32xf32> to vector<2x16x32xf32>
    %25 = vector.extract_strided_slice %22 {offsets = [0, 2, 0], sizes = [2, 16, 32], strides = [1, 1, 1]} : vector<2x20x32xf32> to vector<2x16x32xf32>
    %26 = vector.extract_strided_slice %22 {offsets = [0, 3, 0], sizes = [2, 16, 32], strides = [1, 1, 1]} : vector<2x20x32xf32> to vector<2x16x32xf32>
    %27 = vector.extract_strided_slice %22 {offsets = [0, 4, 0], sizes = [2, 16, 32], strides = [1, 1, 1]} : vector<2x20x32xf32> to vector<2x16x32xf32>
    %28 = tpu.concatenate %23, %24, %25, %26, %27 in 2 : vector<2x16x32xf32>, vector<2x16x32xf32>, vector<2x16x32xf32>, vector<2x16x32xf32>, vector<2x16x32xf32> -> vector<2x16x160xf32>
    %29 = vector.shape_cast %28 : vector<2x16x160xf32> to vector<32x160xf32>
    %cst_15 = arith.constant dense<0.000000e+00> : vector<32x32xf32>
    %30 = tpu.matmul %29, %19, %cst_15 {dimension_numbers = #tpu.dot_dimension_numbers<[1], [0], [0], [1], [0, 0, 1, 1], [], []>} : vector<32x160xf32>, vector<160x32xf32>, vector<32x32xf32> -> vector<32x32xf32>
    %31 = vector.broadcast %20 : vector<1x32xf32> to vector<32x32xf32>
    %32 = arith.addf %30, %31 : vector<32x32xf32>
    %cst_16 = arith.constant 0.000000e+00 : f32
    %33 = vector.broadcast %cst_16 : f32 to vector<32x32xf32>
    %34 = arith.maximumf %32, %33 : vector<32x32xf32>
    %35 = vector.shape_cast %34 : vector<32x32xf32> to vector<2x16x32xf32>
    %cst_17 = arith.constant dense<0.000000e+00> : vector<2x32xf32>
    %36 = vector.multi_reduction <add>, %35, %cst_17 [1] : vector<2x16x32xf32> to vector<2x32xf32>
    %cst_18 = arith.constant 1.600000e+01 : f32
    %37 = vector.broadcast %cst_18 : f32 to vector<2x32xf32>
    %38 = arith.divf %36, %37 : vector<2x32xf32>
    %c0_19 = arith.constant 0 : index
    %c0_20 = arith.constant 0 : index
    %39 = vector.load %arg5[%c0_19, %c0_20] : memref<2x32xf32, #tpu.memory_space<vmem>>, vector<2x32xf32>
    tpu.vector_store %arg5[%c0_19, %c0_20], %38 {strides = array<i32>} : memref<2x32xf32, #tpu.memory_space<vmem>>, vector<2x32xf32>,
    return
  }
}

</mosaic_0001>

<bundles_post_ra>
// kernel: tpu_custom_call.1
= control target key start
LH: loop header
LB: loop body
LE: loop exit
PB: predicated region body
PF: predicated region fallthrough
CT: control target
= control target key end

     0   :  { %vm33_vm0 = vcmask 261120   ;;  %vm79_vm1 = vcmask 1041408   ;;  %vm100_vm2 = vcmask 1046528   ;;  %vm123_vm3 = vcmask 1045504   ;;  %s1111_s0 = inlined_call_operand.vmem [shape: f32[3,2,16,32], index: 0, kind: input, shape index: {}]   ;;  %s1112_s1 = inlined_call_operand.vmem [shape: f32[160,32], index: 1, kind: input, shape index: {}]   ;;  %s1113_s2 = inlined_call_operand.vmem [shape: f32[1,32], index: 2, kind: input, shape index: {}]   ;;  %s1114_s3 = inlined_call_operand.vmem [shape: f32[160,32], index: 3, kind: input, shape index: {}]   ;;  %s1115_s4 = inlined_call_operand.vmem [shape: f32[1,32], index: 4, kind: input, shape index: {}]   ;;  %s1116_s5 = inlined_call_operand.hbm [shape: f32[2,32], index: 5, kind: output, shape index: {}]  }
   0x1   :  { %v21_v0 = vld [vmem:[%s1111_s0] sm:$0xff]  ;;  %v22_v1 = vld [vmem:[%s1111_s0 + $0x8] sm:$0xff]  ;;  %v23_v13 = vld [vmem:[%s1111_s0 + $0x10] sm:$0xff]  ;;  %v704_v37 = vmov 0.0|0.0   ;;  %vm146_vm4 = vcmask 1044480  }
   0x2   :  { %v25_v2 = vld [vmem:[%s1111_s0 + $0x20] sm:$0xff]  ;;  %v26_v3 = vld [vmem:[%s1111_s0 + $0x28] sm:$0xff]  ;;  %v34_v6 = vsel %vm33_vm0, %v21_v0, 0.0  ;;  %v39_v8 = vsel %vm33_vm0, %v22_v1, 0.0  ;;  %v24_v15 = vld [vmem:[%s1111_s0 + $0x18] sm:$0xff]  ;;  %v44_v21 = vsel %vm33_vm0, %v23_v13, 0.0  ;;  %585 = vmatprep.subr.bf16.mxu0 %v704_v37  ;;  %615 = vmatprep.subr.bf16.mxu1 %v704_v37 }
   0x3   :  { %v29_v4 = vld [vmem:[%s1111_s0 + $0x40] sm:$0xff]  ;;  %v30_v5 = vld [vmem:[%s1111_s0 + $0x48] sm:$0xff]  ;;  %v35_v7 = vsel %vm33_vm0, %v25_v2, 0.0  ;;  %v40_v11 = vsel %vm33_vm0, %v26_v3, 0.0  ;;  %v27_v16 = vld [vmem:[%s1111_s0 + $0x30] sm:$0xff]  ;;  %v49_v23 = vsel %vm33_vm0, %v24_v15, 0.0 }
   0x4   :  { %v36_v9 = vadd.f32 %v35_v7, %v34_v6  ;;  %v37_v10 = vsel %vm33_vm0, %v29_v4, 0.0  ;;  %v42_v12 = vsel %vm33_vm0, %v30_v5, 0.0  ;;  %v41_v14 = vadd.f32 %v40_v11, %v39_v8  ;;  %v28_v17 = vld [vmem:[%s1111_s0 + $0x38] sm:$0xff]  ;;  %v31_v19 = vld [vmem:[%s1111_s0 + $0x50] sm:$0xff]  ;;  %v54_v24 = vld [vmem:[%s1112_s1] sm:$0xff] }
   0x5   :  { %v32_v20 = vld [vmem:[%s1111_s0 + $0x58] sm:$0xff]  ;;  %v45_v22 = vsel %vm33_vm0, %v27_v16, 0.0  ;;  %v47_v27 = vsel %vm33_vm0, %v31_v19, 0.0  ;;  %v50_v28 = vsel %vm33_vm0, %v28_v17, 0.0  ;;  %v55_v29 = vld [vmem:[%s1112_s1 + $0x8] sm:$0xff]  ;;  %v56_v30 = vld [vmem:[%s1112_s1 + $0x10] sm:$0xff] }
   0x6   :  { %v38_v18 = vadd.f32 %v37_v10, %v36_v9  ;;  %v43_v25 = vadd.f32 %v42_v12, %v41_v14  ;;  %v46_v26 = vadd.f32 %v45_v22, %v44_v21  ;;  %v57_v31 = vld [vmem:[%s1112_s1 + $0x18] sm:$0xff]  ;;  %v51_v33 = vadd.f32 %v50_v28, %v49_v23  ;;  %v58_v50 = vld [vmem:[%s1112_s1 + $0x20] sm:$0xff]  ;;  %v59_v51 = vld [vmem:[%s1112_s1 + $0x28] sm:$0xff] }
   0x7   :  { %v52_v34 = vsel %vm33_vm0, %v32_v20, 0.0  ;;  %v586_v38 = vpack.c.bf16 %v55_v29, %v54_v24  ;;  %v589_v41 = vpack.c.bf16 %v57_v31, %v56_v30 }
   0x8   :  { %v80_v32 = vrot.slane %v38_v18, 6  ;;  %v81_v35 = vrot.slane %v43_v25, 6  ;;  %v48_v36 = vadd.f32 %v47_v27, %v46_v26  ;;  %v53_v40 = vadd.f32 %v52_v34, %v51_v33 }
   0x9   :  { %587 = vmatpush1.bf16.msra.mxu0 %v586_v38 }
   0xa   :  { %v802_v39 = vsel %vm79_vm1, 0.0, %v80_v32  ;;  %v805_v42 = vsel %vm79_vm1, %v80_v32, %v81_v35  ;;  %v808_v43 = vsel %vm79_vm1, %v81_v35, 0.0  ;;  %588 = vmatprep.subr.bf16.mxu0 %v704_v37  ;;  %v83_v55 = vrot.slane %v48_v36, 6 }
   0xb   :  { %v101_v44 = vrot.slane %v802_v39, 1  ;;  %v124_v45 = vrot.slane %v802_v39, 2  ;;  %v102_v46 = vrot.slane %v805_v42, 1  ;;  %v104_v47 = vrot.slane %v808_v43, 1 }
   0xc   :  { %v125_v48 = vrot.slane %v805_v42, 2  ;;  %v127_v49 = vrot.slane %v808_v43, 2  ;;  %v147_v52 = vrot.slane %v802_v39, 3  ;;  %v148_v53 = vrot.slane %v805_v42, 3 }
   0xd   :  { %v150_v54 = vrot.slane %v808_v43, 3  ;;  %v103_v56 = vsel %vm100_vm2, %v101_v44, %v102_v46  ;;  %v105_v57 = vsel %vm100_vm2, %v102_v46, %v104_v47 }
   0xe   :  { %v126_v58 = vsel %vm123_vm3, %v124_v45, %v125_v48  ;;  %v128_v59 = vsel %vm123_vm3, %v125_v48, %v127_v49 }
   0xf   :  { %10 = vsyncpa [#allocation3], 0  ;;  %v650_v60 = vpack.i.bf16 %v105_v57, %v103_v56  ;;  %v149_v61 = vsel %vm146_vm4, %v147_v52, %v148_v53  ;;  %v151_v62 = vsel %vm146_vm4, %v148_v53, %v150_v54  ;;  %590 = vmatpush1.bf16.msra.mxu0 %v589_v41  ;;  %v592_v63 = vpack.c.bf16 %v59_v51, %v58_v50  ;;  %v60_v0 = vld [vmem:[%s1112_s1 + $0x30] sm:$0xff]  ;;  %v61_v1 = vld [vmem:[%s1112_s1 + $0x38] sm:$0xff]  ;;  %s705_s7 = smov 32   ;;  %s706_s8 = smov 96  }
  0x10   :  { %v660_v2 = vpack.i.bf16 %v151_v62, %v149_v61  ;;  %v84_v3 = vrot.slane %v53_v40, 6  ;;  %v839_v4 = vsel %vm79_vm1, 0.0, %v83_v55  ;;  %591 = vmatprep.subr.bf16.mxu0 %v704_v37  ;;  %v655_v5 = vpack.i.bf16 %v128_v59, %v126_v58  ;;  %v62_v11 = vld [vmem:[%s1112_s1 + $0x40] sm:$0xff]  ;;  %v63_v12 = vld [vmem:[%s1112_s1 + $0x48] sm:$0xff]  ;;  %s707_s13 = smov 64   ;;  %v64_v26 = vld [vmem:[%s1112_s1 + $0x50] sm:$0xff] }
  0x11   :  { %651 = vrot.lane.b32.xlu0 %v650_v60, %s705_s7  ;;  %v106_v6 = vrot.slane %v839_v4, 1  ;;  %v129_v8 = vrot.slane %v839_v4, 2  ;;  %v152_v9 = vrot.slane %v839_v4, 3  ;;  %v595_v10 = vpack.c.bf16 %v61_v1, %v60_v0  ;;  %v65_v27 = vld [vmem:[%s1112_s1 + $0x58] sm:$0xff]  ;;  %v66_v34 = vld [vmem:[%s1112_s1 + $0x60] sm:$0xff]  ;;  %v67_v35 = vld [vmem:[%s1112_s1 + $0x68] sm:$0xff] }
  0x12   :  { %661 = vrot.lane.b32.xlu1 %v660_v2, %s706_s8  ;;  %v846_v7 = vsel %vm79_vm1, %v83_v55, %v84_v3  ;;  %v860_v16 = vsel %vm79_vm1, %v84_v3, 0.0  ;;  %v598_v18 = vpack.c.bf16 %v63_v12, %v62_v11  ;;  %vm169_vm5 = vcmask 1043456   ;;  %v68_v40 = vld [vmem:[%s1112_s1 + $0x70] sm:$0xff]  ;;  %v69_v41 = vld [vmem:[%s1112_s1 + $0x78] sm:$0xff]  ;;  %v70_v44 = vld [vmem:[%s1112_s1 + $0x80] sm:$0xff] }
  0x13   :  { %v107_v13 = vrot.slane %v846_v7, 1  ;;  %v130_v14 = vrot.slane %v846_v7, 2  ;;  %v153_v15 = vrot.slane %v846_v7, 3  ;;  %593 = vmatpush1.bf16.msra.mxu0 %v592_v63  ;;  %v109_v20 = vrot.slane %v860_v16, 1  ;;  %v71_v45 = vld [vmem:[%s1112_s1 + $0x88] sm:$0xff]  ;;  %v72_v47 = vld [vmem:[%s1112_s1 + $0x90] sm:$0xff] }
  0x14   :  { %594 = vmatprep.subr.bf16.mxu0 %v704_v37  ;;  %v170_v21 = vrot.slane %v802_v39, 4  ;;  %v132_v23 = vrot.slane %v860_v16, 2  ;;  %v171_v24 = vrot.slane %v805_v42, 4  ;;  %v173_v25 = vrot.slane %v808_v43, 4  ;;  %v73_v48 = vld [vmem:[%s1112_s1 + $0x98] sm:$0xff] }
  0x15   :  { %656 = vrot.lane.b32.xlu0 %v655_v5, %s707_s13  ;;  %v108_v17 = vsel %vm100_vm2, %v106_v6, %v107_v13  ;;  %v131_v19 = vsel %vm123_vm3, %v129_v8, %v130_v14  ;;  %v154_v22 = vsel %vm146_vm4, %v152_v9, %v153_v15  ;;  %v110_v30 = vsel %vm100_vm2, %v107_v13, %v109_v20  ;;  %v300_v20 = vld [vmem:[%s1114_s3 + $0x18] sm:$0xff] }
  0x16   :  { %115 = vrot.lane.b32.xlu1 %v108_v17, %s705_s7  ;;  %v172_v28 = vsel %vm169_vm5, %v170_v21, %v171_v24  ;;  %v174_v29 = vsel %vm169_vm5, %v171_v24, %v173_v25  ;;  %v155_v31 = vrot.slane %v860_v16, 3  ;;  %v133_v32 = vsel %vm123_vm3, %v130_v14, %v132_v23  ;;  %v298_v17 = vld [vmem:[%s1114_s3 + $0x8] sm:$0xff]  ;;  %v303_v25 = vld [vmem:[%s1114_s3 + $0x30] sm:$0xff] }
  0x17   :  { %596 = vmatpush1.bf16.msra.mxu0 %v595_v10  ;;  %576 = vmatprep.mubr.msk.f32.mxu0 %vm33_vm0, %v172_v28  ;;  %v601_v33 = vpack.c.bf16 %v65_v27, %v64_v26  ;;  %v604_v38 = vpack.c.bf16 %v67_v35, %v66_v34  ;;  %v607_v43 = vpack.c.bf16 %v69_v41, %v68_v40  ;;  %vm184_vm6 = vcmask 523264   ;;  %v302_v23 = vld [vmem:[%s1114_s3 + $0x28] sm:$0xff]  ;;  %v304_v26 = vld [vmem:[%s1114_s3 + $0x38] sm:$0xff]  ;;  %v305_v28 = vld [vmem:[%s1114_s3 + $0x40] sm:$0xff] }
  0x18   :  { %597 = vmatprep.subr.bf16.mxu0 %v704_v37  ;;  %v156_v36 = vsel %vm146_vm4, %v153_v15, %v155_v31  ;;  %v610_v46 = vpack.c.bf16 %v71_v45, %v70_v44  ;;  %v613_v49 = vpack.c.bf16 %v73_v48, %v72_v47  ;;  %vm189_vm7 = vcmask 785408   ;;  %v307_v31 = vld [vmem:[%s1114_s3 + $0x50] sm:$0xff]  ;;  %v309_v34 = vld [vmem:[%s1114_s3 + $0x60] sm:$0xff]  ;;  %v310_v35 = vld [vmem:[%s1114_s3 + $0x68] sm:$0xff] }
  0x19   :  { %138 = vrot.lane.b32.xlu0 %v131_v19, %s707_s13  ;;  %v175_v61 = vrot.slane %v839_v4, 4  ;;  %v176_v62 = vrot.slane %v846_v7, 4  ;;  %v178_v9 = vrot.slane %v860_v16, 4  ;;  %v625_v27 = vpack.c.bf16 %v304_v26, %v303_v25  ;;  %v312_v40 = vld [vmem:[%s1114_s3 + $0x78] sm:$0xff] }
  0x1a   :  { %161 = vrot.lane.b32.xlu1 %v154_v22, %s706_s8  ;;  %v301_v22 = vld [vmem:[%s1114_s3 + $0x20] sm:$0xff]  ;;  %vm556_vm8 = vcmask 1041409   ;;  %vm559_vm9 = vcmask 254976  }
  0x1b   :  { %599 = vmatpush1.bf16.msra.mxu0 %v598_v18  ;;  %v177_v8 = vsel %vm169_vm5, %v175_v61, %v176_v62  ;;  %v179_v14 = vsel %vm169_vm5, %v176_v62, %v178_v9  ;;  %v299_v18 = vld [vmem:[%s1114_s3 + $0x10] sm:$0xff]  ;;  %v622_v24 = vpack.c.bf16 %v302_v23, %v301_v22  ;;  %v316_v62 = vld [vmem:[%s1114_s3 + $0x98] sm:$0xff] }
  0x1c   :  { %600 = vmatprep.subr.bf16.mxu0 %v704_v37  ;;  %v619_v21 = vpack.c.bf16 %v300_v20, %v299_v18 }
  0x1d   :  { %117 = vrot.lane.b32.xlu0 %v110_v30, %s705_s7 }
  0x1e   :  { %140 = vrot.lane.b32.xlu1 %v133_v32, %s707_s13  ;;  %v308_v32 = vld [vmem:[%s1114_s3 + $0x58] sm:$0xff] }
  0x1f   :  { %602 = vmatpush1.bf16.msra.mxu0 %v601_v33  ;;  %v631_v33 = vpack.c.bf16 %v308_v32, %v307_v31 }
  0x20   :  { %603 = vmatprep.subr.bf16.mxu0 %v704_v37 }
  0x21   :  { %163 = vrot.lane.b32.xlu0 %v156_v36, %s706_s8  ;;  %v634_v36 = vpack.c.bf16 %v310_v35, %v309_v34 }
  0x23   :  { %605 = vmatpush1.bf16.msra.mxu0 %v604_v38  ;;  %v311_v38 = vld [vmem:[%s1114_s3 + $0x70] sm:$0xff] }
  0x24   :  { %606 = vmatprep.subr.bf16.mxu0 %v704_v37  ;;  %v637_v41 = vpack.c.bf16 %v312_v40, %v311_v38 }
  0x27   :  { %608 = vmatpush1.bf16.msra.mxu0 %v607_v43  ;;  %v575_v43 = vld [vmem:[%s1113_s2] ss:$0 sm:$0xff] }
  0x28   :  { %609 = vmatprep.subr.bf16.mxu0 %v704_v37 }
  0x2b   :  { %611 = vmatpush1.bf16.msra.mxu0 %v610_v46 }
  0x2c   :  { %612 = vmatprep.subr.bf16.mxu0 %v704_v37 }
  0x2f   :  { %614 = vmatpush1.bf16.msra.mxu0 %v613_v49  ;;  %v313_v49 = vld [vmem:[%s1114_s3 + $0x80] sm:$0xff] }
  0x83   :  { %v652_v50 = vpop.permute.xlu0 %651 }
  0x84   :  { %v662_v51 = vpop.permute.xlu1 %661  ;;  %v653_v52 = vunpack.i.l.bf16 %v652_v50  ;;  %v654_v53 = vunpack.i.h.bf16 %v652_v50  ;;  %v314_v50 = vld [vmem:[%s1114_s3 + $0x88] sm:$0xff] }
  0x85   :  { %v663_v55 = vunpack.i.l.bf16 %v662_v51  ;;  %v664_v63 = vunpack.i.h.bf16 %v662_v51 }
  0x86   :  { %v180_v59 = vsel %vm33_vm0, %v802_v39, %v653_v52  ;;  %v181_v3 = vsel %vm33_vm0, %v805_v42, %v654_v53 }
  0x87   :  { %v657_v54 = vpop.permute.xlu0 %656 }
  0x88   :  { %v659_v56 = vunpack.i.h.bf16 %v657_v54  ;;  %v658_v57 = vunpack.i.l.bf16 %v657_v54  ;;  %v116_v58 = vpop.permute.xlu1 %115  ;;  %v640_v54 = vpack.c.bf16 %v314_v50, %v313_v49 }
  0x89   :  { %v182_v1 = vsel %vm33_vm0, %v839_v4, %v116_v58 }
  0x8a   :  { %v185_v60 = vsel %vm184_vm6, %v180_v59, %v658_v57  ;;  %v186_v5 = vsel %vm184_vm6, %v181_v3, %v659_v56  ;;  %v315_v57 = vld [vmem:[%s1114_s3 + $0x90] sm:$0xff] }
  0x8b   :  { %v190_v0 = vsel %vm189_vm7, %v185_v60, %v663_v55  ;;  %v139_v2 = vpop.permute.xlu0 %138  ;;  %v191_v10 = vsel %vm189_vm7, %v186_v5, %v664_v63  ;;  %v643_v63 = vpack.c.bf16 %v316_v62, %v315_v57 }
  0x8c   :  { %273 = vmatmul.mubr.f32.vlgmr.msra.gmra.mrb[0].mxu0 %v190_v0  ;;  %v162_v39 = vpop.permute.xlu1 %161  ;;  %v187_v6 = vsel %vm184_vm6, %v182_v1, %v139_v2 }
  0x8d   :  { %577 = vmatprep.mubr.msk.f32.mxu0 %vm33_vm0, %v174_v29  ;;  %v192_v12 = vsel %vm189_vm7, %v187_v6, %v162_v39  ;;  %v306_v29 = vld [vmem:[%s1114_s3 + $0x48] sm:$0xff] }
  0x8e   :  { %v628_v30 = vpack.c.bf16 %v306_v29, %v305_v28 }
  0x8f   :  { %v118_v11 = vpop.permute.xlu0 %117 }
  0x90   :  { %278 = vmatmul.mubr.f32.gmra.mrb[2].mxu0 %v191_v10  ;;  %v183_v4 = vsel %vm33_vm0, %v846_v7, %v118_v11  ;;  %v141_v42 = vpop.permute.xlu1 %140  ;;  %v297_v7 = vld [vmem:[%s1114_s3] sm:$0xff] }
  0x91   :  { %578 = vmatprep.mubr.msk.f32.mxu0 %vm33_vm0, %v177_v8  ;;  %v188_v13 = vsel %vm184_vm6, %v183_v4, %v141_v42  ;;  %v616_v19 = vpack.c.bf16 %v298_v17, %v297_v7 }
  0x93   :  { %v164_v15 = vpop.permute.xlu0 %163  ;;  %617 = vmatpush1.bf16.msra.mxu1 %v616_v19 }
  0x94   :  { %283 = vmatmul.mubr.f32.gmra.mrb[4].mxu0 %v192_v12  ;;  %v193_v16 = vsel %vm189_vm7, %v188_v13, %v164_v15  ;;  %618 = vmatprep.subr.bf16.mxu1 %v704_v37 }
  0x95   :  { %579 = vmatprep.mubr.msk.f32.mxu0 %vm33_vm0, %v179_v14 }
  0x97   :  { %620 = vmatpush1.bf16.msra.mxu1 %v619_v21 }
  0x98   :  { %288 = vmatmul.mubr.f32.gmra.mrb[6].mxu0 %v193_v16  ;;  %621 = vmatprep.subr.bf16.mxu1 %v704_v37 }
  0x9b   :  { %623 = vmatpush1.bf16.msra.mxu1 %v622_v24 }
  0x9c   :  { %624 = vmatprep.subr.bf16.mxu1 %v704_v37 }
  0x9f   :  { %626 = vmatpush1.bf16.msra.mxu1 %v625_v27 }
  0xa0   :  { %627 = vmatprep.subr.bf16.mxu1 %v704_v37 }
  0xa3   :  { %629 = vmatpush1.bf16.msra.mxu1 %v628_v30 }
  0xa4   :  { %630 = vmatprep.subr.bf16.mxu1 %v704_v37 }
  0xa7   :  { %632 = vmatpush1.bf16.msra.mxu1 %v631_v33 }
  0xa8   :  { %633 = vmatprep.subr.bf16.mxu1 %v704_v37 }
  0xab   :  { %635 = vmatpush1.bf16.msra.mxu1 %v634_v36 }
  0xac   :  { %636 = vmatprep.subr.bf16.mxu1 %v704_v37 }
  0xaf   :  { %638 = vmatpush1.bf16.msra.mxu1 %v637_v41 }
  0xb0   :  { %639 = vmatprep.subr.bf16.mxu1 %v704_v37 }
  0xb3   :  { %641 = vmatpush1.bf16.msra.mxu1 %v640_v54 }
  0xb4   :  { %642 = vmatprep.subr.bf16.mxu1 %v704_v37 }
  0xb7   :  { %644 = vmatpush1.bf16.msra.mxu1 %v643_v63 }
 0x15f   :  { %v274_v44 = vpop.f32.mrb[0].mxu0 }
 0x160   :  { %v275_v45 = vadd.f32 %v575_v43, %v274_v44  ;;  %v276_v46 = vpop.f32.mrb[1].mxu0 }
 0x162   :  { %v293_v47 = vmax.f32 %v275_v45, 0.0 }
 0x163   :  { %v279_v48 = vpop.f32.mrb[2].mxu0 }
 0x164   :  { %v322_v51 = vrot.slane %v293_v47, 6  ;;  %v280_v52 = vadd.f32 %v575_v43, %v279_v48  ;;  %v281_v53 = vpop.f32.mrb[3].mxu0 }
 0x166   :  { %v294_v55 = vmax.f32 %v280_v52, 0.0  ;;  %v1015_v58 = vsel %vm79_vm1, 0.0, %v322_v51 }
 0x167   :  { %v284_v56 = vpop.f32.mrb[4].mxu0  ;;  %v408_v39 = vrot.slane %v1015_v58, 4  ;;  %v364_v6 = vrot.slane %v1015_v58, 2  ;;  %v342_v12 = vrot.slane %v1015_v58, 1  ;;  %v386_v21 = vrot.slane %v1015_v58, 3 }
 0x168   :  { %v323_v59 = vrot.slane %v294_v55, 6  ;;  %v285_v60 = vadd.f32 %v575_v43, %v284_v56  ;;  %v286_v61 = vpop.f32.mrb[5].mxu0 }
 0x16a   :  { %v1021_v0 = vsel %vm79_vm1, %v322_v51, %v323_v59  ;;  %v336_v37 = vsel %vm79_vm1, %v323_v59, 0.0  ;;  %v295_v1 = vmax.f32 %v285_v60, 0.0 }
 0x16b   :  { %v345_v2 = vrot.slane %v336_v37, 1  ;;  %v367_v3 = vrot.slane %v336_v37, 2  ;;  %v289_v5 = vpop.f32.mrb[6].mxu0  ;;  %v409_v11 = vrot.slane %v1021_v0, 4  ;;  %v365_v4 = vrot.slane %v1021_v0, 2 }
 0x16c   :  { %v325_v8 = vrot.slane %v295_v1, 6  ;;  %v290_v9 = vadd.f32 %v575_v43, %v289_v5  ;;  %v291_v10 = vpop.f32.mrb[7].mxu0  ;;  %v389_v42 = vrot.slane %v336_v37, 3  ;;  %v343_v13 = vrot.slane %v1021_v0, 1 }
 0x16d   :  { %v387_v14 = vrot.slane %v1021_v0, 3  ;;  %v411_v15 = vrot.slane %v336_v37, 4  ;;  %v410_v7 = vsel %vm169_vm5, %v408_v39, %v409_v11  ;;  %v366_v17 = vsel %vm123_vm3, %v364_v6, %v365_v4 }
 0x16e   :  { %v296_v16 = vmax.f32 %v290_v9, 0.0  ;;  %581 = vmatprep.mubr.msk.f32.mxu1 %vm33_vm0, %v410_v7  ;;  %v368_v18 = vsel %vm123_vm3, %v365_v4, %v367_v3  ;;  %v344_v19 = vsel %vm100_vm2, %v342_v12, %v343_v13  ;;  %v346_v20 = vsel %vm100_vm2, %v343_v13, %v345_v2 }
 0x16f   :  { %v1039_v22 = vsel %vm79_vm1, 0.0, %v325_v8  ;;  %v670_v24 = vpack.i.bf16 %v368_v18, %v366_v17  ;;  %v665_v25 = vpack.i.bf16 %v346_v20, %v344_v19  ;;  %v388_v26 = vsel %vm146_vm4, %v386_v21, %v387_v14 }
 0x170   :  { %v326_v23 = vrot.slane %v296_v16, 6  ;;  %v390_v27 = vsel %vm146_vm4, %v387_v14, %v389_v42  ;;  %v412_v29 = vsel %vm169_vm5, %v409_v11, %v411_v15  ;;  %v347_v30 = vrot.slane %v1039_v22, 1  ;;  %v580_v16 = vld [vmem:[%s1115_s4] ss:$0 sm:$0xff]  ;;  %s708_s4 = smov [#allocation2]  }
 0x171   :  { %671 = vrot.lane.b32.xlu0 %v670_v24, %s707_s13  ;;  %666 = vrot.lane.b32.xlu1 %v665_v25, %s705_s7  ;;  %v675_v32 = vpack.i.bf16 %v390_v27, %v388_v26  ;;  %v369_v38 = vrot.slane %v1039_v22, 2  ;;  %v391_v40 = vrot.slane %v1039_v22, 3  ;;  %v413_v39 = vrot.slane %v1039_v22, 4 }
 0x172   :  { %v1044_v28 = vsel %vm79_vm1, %v325_v8, %v326_v23  ;;  %v337_v36 = vsel %vm79_vm1, %v326_v23, 0.0 }
 0x173   :  { %v348_v31 = vrot.slane %v1044_v28, 1  ;;  %v370_v34 = vrot.slane %v1044_v28, 2  ;;  %v392_v35 = vrot.slane %v1044_v28, 3  ;;  %v350_v44 = vrot.slane %v337_v36, 1 }
 0x174   :  { %v372_v45 = vrot.slane %v337_v36, 2  ;;  %v394_v48 = vrot.slane %v337_v36, 3  ;;  %v414_v3 = vrot.slane %v1044_v28, 4  ;;  %v416_v8 = vrot.slane %v337_v36, 4 }
 0x175   :  { %v349_v33 = vsel %vm100_vm2, %v347_v30, %v348_v31  ;;  %676 = vrot.lane.b32.xlu1 %v675_v32, %s706_s8  ;;  %v371_v41 = vsel %vm123_vm3, %v369_v38, %v370_v34  ;;  %v393_v43 = vsel %vm146_vm4, %v391_v40, %v392_v35  ;;  %v351_v46 = vsel %vm100_vm2, %v348_v31, %v350_v44 }
 0x176   :  { %356 = vrot.lane.b32.xlu0 %v349_v33, %s705_s7  ;;  %v373_v47 = vsel %vm123_vm3, %v370_v34, %v372_v45  ;;  %v395_v49 = vsel %vm146_vm4, %v392_v35, %v394_v48  ;;  %v415_v10 = vsel %vm169_vm5, %v413_v39, %v414_v3  ;;  %v417_v14 = vsel %vm169_vm5, %v414_v3, %v416_v8 }
 0x179   :  { %378 = vrot.lane.b32.xlu1 %v371_v41, %s707_s13 }
 0x17a   :  { %400 = vrot.lane.b32.xlu0 %v393_v43, %s706_s8 }
 0x17d   :  { %358 = vrot.lane.b32.xlu1 %v351_v46, %s705_s7 }
 0x17e   :  { %380 = vrot.lane.b32.xlu0 %v373_v47, %s707_s13 }
 0x181   :  { %402 = vrot.lane.b32.xlu1 %v395_v49, %s706_s8  ;;  %s567_s8 = sshll.u32 %s708_s4, 4  ;;  %s568_s8 = int_to_ptr.vmem [resolvable:$true] %s567_s8 }
 0x182   :  { %s680_s13 = scalar_lea.vmem %s568_s8, 32  ;;  %p685_p1 = scmp.lt.s32.totalorder %s568_s8, %s568_s8 }
 0x183   :  { %p681_p0 = scmp.ne.s32.totalorder %s568_s8, %s680_s13  ;;  %p686_p2 = scmp.lt.s32.totalorder %s680_s13, %s680_s13 }
 0x185   :  { %p687_p3 = por %p686_p2, %p685_p1 }
 0x187   :  { %p688_p4 = pnand %p687_p3, %p681_p0 }
 0x1e3   :  { %v672_v50 = vpop.permute.xlu0 %671  ;;  %v667_v51 = vpop.permute.xlu1 %666 }
 0x1e4   :  { %v668_v52 = vunpack.i.l.bf16 %v667_v51  ;;  %v673_v53 = vunpack.i.l.bf16 %v672_v50  ;;  %v669_v54 = vunpack.i.h.bf16 %v667_v51  ;;  %v674_v60 = vunpack.i.h.bf16 %v672_v50 }
 0x1e6   :  { %v418_v55 = vsel %vm33_vm0, %v1015_v58, %v668_v52  ;;  %v419_v37 = vsel %vm33_vm0, %v1021_v0, %v669_v54 }
 0x1e7   :  { %v677_v56 = vpop.permute.xlu1 %676  ;;  %v422_v61 = vsel %vm184_vm6, %v418_v55, %v673_v53  ;;  %v423_v5 = vsel %vm184_vm6, %v419_v37, %v674_v60 }
 0x1e8   :  { %v357_v57 = vpop.permute.xlu0 %356  ;;  %v678_v59 = vunpack.i.l.bf16 %v677_v56  ;;  %v679_v62 = vunpack.i.h.bf16 %v677_v56 }
 0x1e9   :  { %v420_v58 = vsel %vm33_vm0, %v1039_v22, %v357_v57 }
 0x1ea   :  { %v426_v63 = vsel %vm189_vm7, %v422_v61, %v678_v59  ;;  %v427_v6 = vsel %vm189_vm7, %v423_v5, %v679_v62 }
 0x1eb   :  { %v379_v1 = vpop.permute.xlu1 %378  ;;  %509 = vmatmul.mubr.f32.vlgmr.msra.gmra.mrb[0].mxu1 %v426_v63 }
 0x1ec   :  { %v401_v2 = vpop.permute.xlu0 %400  ;;  %582 = vmatprep.mubr.msk.f32.mxu1 %vm33_vm0, %v412_v29  ;;  %v424_v9 = vsel %vm184_vm6, %v420_v58, %v379_v1 }
 0x1ed   :  { %v428_v42 = vsel %vm189_vm7, %v424_v9, %v401_v2 }
 0x1ef   :  { %v359_v0 = vpop.permute.xlu1 %358  ;;  %514 = vmatmul.mubr.f32.gmra.mrb[2].mxu1 %v427_v6 }
 0x1f0   :  { %v421_v11 = vsel %vm33_vm0, %v1044_v28, %v359_v0  ;;  %583 = vmatprep.mubr.msk.f32.mxu1 %vm33_vm0, %v415_v10  ;;  %v381_v4 = vpop.permute.xlu0 %380 }
 0x1f1   :  { %v425_v12 = vsel %vm184_vm6, %v421_v11, %v381_v4 }
 0x1f3   :  { %v403_v13 = vpop.permute.xlu1 %402  ;;  %519 = vmatmul.mubr.f32.gmra.mrb[4].mxu1 %v428_v42 }
 0x1f4   :  { %584 = vmatprep.mubr.msk.f32.mxu1 %vm33_vm0, %v417_v14  ;;  %v429_v15 = vsel %vm189_vm7, %v425_v12, %v403_v13 }
 0x1f7   :  { %524 = vmatmul.mubr.f32.gmra.mrb[6].mxu1 %v429_v15 }
 0x2be   :  { %v510_v7 = vpop.f32.mrb[0].mxu1 }
 0x2bf   :  { %v511_v17 = vadd.f32 %v580_v16, %v510_v7  ;;  %v512_v18 = vpop.f32.mrb[1].mxu1 }
 0x2c1   :  { %v529_v20 = vmax.f32 %v511_v17, 0.0 }
 0x2c2   :  { %v515_v19 = vpop.f32.mrb[2].mxu1 }
 0x2c3   :  { %v516_v21 = vadd.f32 %v580_v16, %v515_v19  ;;  %v517_v22 = vpop.f32.mrb[3].mxu1  ;;  %v533_v25 = vsel %vm33_vm0, %v529_v20, 0.0 }
 0x2c5   :  { %v530_v23 = vmax.f32 %v516_v21, 0.0 }
 0x2c6   :  { %v520_v24 = vpop.f32.mrb[4].mxu1 }
 0x2c7   :  { %v534_v26 = vsel %vm33_vm0, %v530_v23, 0.0  ;;  %v521_v27 = vadd.f32 %v580_v16, %v520_v24  ;;  %v522_v28 = vpop.f32.mrb[5].mxu1 }
 0x2c8   :  { %v535_v29 = vadd.f32 %v534_v26, %v533_v25 }
 0x2c9   :  { %v531_v32 = vmax.f32 %v521_v27, 0.0 }
 0x2ca   :  { %v536_v30 = vrot.slane %v535_v29, 4  ;;  %v525_v31 = vpop.f32.mrb[6].mxu1 }
 0x2cb   :  { %v526_v33 = vadd.f32 %v580_v16, %v525_v31  ;;  %v527_v34 = vpop.f32.mrb[7].mxu1  ;;  %v542_v40 = vsel %vm33_vm0, %v531_v32, 0.0 }
 0x2cc   :  { %v537_v35 = vadd.f32 %v536_v30, %v535_v29 }
 0x2cd   :  { %v532_v36 = vmax.f32 %v526_v33, 0.0 }
 0x2ce   :  { %v538_v38 = vrot.slane %v537_v35, 2 }
 0x2cf   :  { %v543_v41 = vsel %vm33_vm0, %v532_v36, 0.0 }
 0x2d0   :  { %v544_v43 = vadd.f32 %v543_v41, %v542_v40  ;;  %v539_v44 = vadd.f32 %v538_v38, %v537_v35 }
 0x2d2   :  { %v545_v45 = vrot.slane %v544_v43, 4  ;;  %v540_v48 = vrot.slane %v539_v44, 1 }
 0x2d4   :  { %v546_v46 = vadd.f32 %v545_v45, %v544_v43  ;;  %v541_v50 = vadd.f32 %v540_v48, %v539_v44 }
 0x2d6   :  { %v547_v47 = vrot.slane %v546_v46, 2  ;;  %v552_v53 = vmul.f32 0.0625, %v541_v50 }
 0x2d8   :  { %v548_v49 = vadd.f32 %v547_v47, %v546_v46 }
 0x2da   :  { %v549_v51 = vrot.slane %v548_v49, 1 }
 0x2dc   :  { %v550_v52 = vadd.f32 %v549_v51, %v548_v49 }
 0x2de   :  { %v553_v54 = vmul.f32 0.0625, %v550_v52 }
 0x2e0   :  { %v557_v55 = vsel %vm556_vm8, %v553_v54, %v552_v53 }
 0x2e1   :  { %560 = vst.msk [vmem:[#allocation2] sm:$0x3] %vm559_vm9, %v557_v55 }
 0x2e2   :  { %691 = shalt.err (!%p688_p4)
}
 0x2e3   :  { %s692_s28 = scalar_lea.hbm %s1116_s5, 32 }
 0x2e4   :  { %p693_p5 = scmp.ne.s32.totalorder %s1116_s5, %s692_s28  ;;  %p696_p6 = scmp.lt.u32.totalorder %s692_s28, %s1116_s5 }
 0x2e6   :  { %p698_p7 = pnand %p696_p6, %p693_p5 }
 0x2e8   :  { %701 = shalt.err (!%p698_p7)
}
 0x2e9   :  { %570 = dma.vmem_to_hbm [thread:$0]  %s568_s8, 32, %s1116_s5, [#allocation3]  }
 0x2ea   :  { %702 = dma.done.wait [#allocation3], 32  }
 0x2eb   :  { %703 = vsyncadd [#allocation3], 4294967264 }
 0x2ec   :  { %574 = vsyncpa [#allocation3], 1 }

</bundles_post_ra>
